<compile_context>
chip_gen: v7x
topology: tpu7x:2x2x1
jax: 0.10.0
libtpu: 0.0.40
codegen_flags: <defaults>
</compile_context>

<pallas_src>
import functools

import jax
import jax.numpy as jnp
from jax.experimental import pallas as pl
from jax.experimental.pallas import tpu as pltpu


def _round_up(a, b):
    return (a + b - 1) // b * b


def _conv_mm_kernel(x_ref, w_ref, *rest, add_bias, activation):
    """One grid step = one M-tile: fused (TM, KKC) @ (KKC, Cout_pad) matmul."""
    if add_bias:
        b_ref, o_ref = rest
    else:
        (o_ref,) = rest
    # bf16 x bf16 on the MXU, accumulated in f32.
    acc = jnp.dot(x_ref[...], w_ref[...], preferred_element_type=jnp.float32)
    if add_bias:
        acc = acc + b_ref[...]          # f32 epilogue (v5e-friendly)
    if activation is not None:
        acc = activation(acc)
    o_ref[...] = acc.astype(o_ref.dtype)


def _im2col(x_nhwc, KH, KW, stride, pad):
    """(N,H,W,C) -> (N*Ho*Wo, KH*KW*C) patch matrix; lane order (kh, kw, cin)."""
    N, H, W, C = x_nhwc.shape
    Ho = (H + 2 * pad - KH) // stride + 1
    Wo = (W + 2 * pad - KW) // stride + 1
    xp = jnp.pad(x_nhwc, ((0, 0), (pad, pad), (pad, pad), (0, 0)))
    cols = []
    for kh in range(KH):
        for kw in range(KW):
            cols.append(
                xp[:, kh: kh + stride * (Ho - 1) + 1: stride,
                      kw: kw + stride * (Wo - 1) + 1: stride, :])
    patches = jnp.stack(cols, axis=3)            # (N, Ho, Wo, KH*KW, Cin)
    return patches.reshape(N * Ho * Wo, KH * KW * C), Ho, Wo


def base_conv_forward(x_nchw, weight_oihw, bias, *, stride=1, use_bn=False,
                      activation=None):
    """Equivalent of BaseConv.forward: conv (padding=kernel//2) [+ BN] [+ act]."""
    Cout, Cin, KH, KW = weight_oihw.shape
    pad = KH // 2                        # matches nn.Conv2d(..., padding=kernel//2)
    N = x_nchw.shape[0]

    # NCHW -> NHWC, bf16 for the MXU (accumulation stays f32).
    x_nhwc = jnp.transpose(x_nchw, (0, 2, 3, 1)).astype(jnp.bfloat16)
    patches, Ho, Wo = _im2col(x_nhwc, KH, KW, stride, pad)     # (M, KKC) bf16
    M = N * Ho * Wo
    KKC = KH * KW * Cin

    # OIHW -> (KH, KW, Cin, Cout) -> (KKC, Cout); zero-pad Cout to 128 lanes so
    # output stores are unmasked (MXU already pads the N dim, so no extra flops).
    Cout_pad = _round_up(Cout, 128)
    w = jnp.transpose(weight_oihw, (2, 3, 1, 0)).reshape(KKC, Cout)
    w = jnp.pad(w, ((0, 0), (0, Cout_pad - Cout))).astype(jnp.bfloat16)
    b2d = jnp.pad(bias.reshape(1, Cout).astype(jnp.float32),
                  ((0, 0), (0, Cout_pad - Cout)))

    # M tile: keep the double-buffered working set around 14 MiB so it fits all
    # generations (incl. v7x's 64 MiB physical / 32 MiB default scoped VMEM).
    per_row_bytes = KKC * 2 * 2 + Cout_pad * 4 * 2   # bf16 LHS + f32 out, x2 bufs
    tm = min(2048, max(256, (14 * 1024 * 1024) // per_row_bytes))
    tm = max(256, (tm // 256) * 256)
    tm = min(tm, _round_up(M, 8))                    # small problems: single tile
    M_pad = _round_up(M, tm)
    if M_pad > M:
        patches = jnp.pad(patches, ((0, M_pad - M), (0, 0)))

    add_bias = not use_bn       # gamma=1/beta=0 BN exactly cancels a channel bias
    fused_act = None if use_bn else activation       # BN path: act after BN

    kernel = functools.partial(_conv_mm_kernel, add_bias=add_bias,
                               activation=fused_act)

    in_specs = [
        pl.BlockSpec((tm, KKC), lambda i: (i, 0)),            # M-tiled patches
        pl.BlockSpec((KKC, Cout_pad), lambda i: (0, 0)),      # weight, loaded once
    ]
    args = [patches, w]
    if add_bias:
        in_specs.append(pl.BlockSpec((1, Cout_pad), lambda i: (0, 0)))
        args.append(b2d)

    out_flat = pl.pallas_call(
        kernel,
        out_shape=jax.ShapeDtypeStruct((M_pad, Cout_pad), jnp.float32),
        grid_spec=pltpu.PrefetchScalarGridSpec(
            num_scalar_prefetch=0,
            grid=(M_pad // tm,),
            in_specs=in_specs,
            out_specs=pl.BlockSpec((tm, Cout_pad), lambda i: (i, 0)),
        ),
        compiler_params=pltpu.CompilerParams(
            dimension_semantics=("parallel",),       # megacore split on v7x
            vmem_limit_bytes=32 * 1024 * 1024,
        ),
    )(*args)

    # (M_pad, Cout_pad) -> (N, Ho, Wo, Cout); drop row/lane padding.
    out = out_flat[:M, :Cout].reshape(N, Ho, Wo, Cout)

    if use_bn:
        # Fresh-module, train-mode BatchNorm2d (gamma=1, beta=0, eps=1e-5).
        # Computed here so the per-channel stats span ALL M tiles (correct
        # under tiling); the conv bias was skipped in-kernel (cancelled).
        mean = jnp.mean(out, axis=(0, 1, 2), keepdims=True)
        var = jnp.mean((out - mean) ** 2, axis=(0, 1, 2), keepdims=True)
        out = (out - mean) * jax.lax.rsqrt(var + 1e-5)
        if activation is not None:
            out = activation(out)

    return jnp.transpose(out, (0, 3, 1, 2))          # NHWC -> NCHW


def _reference(x, w, b, *, stride, pad, use_bn, activation, match_bf16):
    """XLA reference; match_bf16=True applies the same input rounding as the kernel."""
    xr, wr = x, w
    if match_bf16:
        xr = xr.astype(jnp.bfloat16).astype(jnp.float32)
        wr = wr.astype(jnp.bfloat16).astype(jnp.float32)
    y = jax.lax.conv_general_dilated(
        xr, wr, (stride, stride), [(pad, pad), (pad, pad)],
        dimension_numbers=("NCHW", "OIHW", "NCHW"),
    ) + b[None, :, None, None]
    if use_bn:
        mean = jnp.mean(y, axis=(0, 2, 3), keepdims=True)
        var = jnp.mean((y - mean) ** 2, axis=(0, 2, 3), keepdims=True)
        y = (y - mean) * jax.lax.rsqrt(var + 1e-5)
    if activation is not None:
        y = activation(y)
    return y


if __name__ == "__main__":
    key = jax.random.PRNGKey(0)
    k_x, k_w = jax.random.split(key)

    # Small shapes consistent with the module: batch=2, Cin=4, Cout=8, 16x16, k=3.
    N, Cin, H, W = 2, 4, 16, 16
    Cout, K, stride = 8, 3, 1
    pad = K // 2

    x = jax.random.normal(k_x, (N, Cin, H, W), dtype=jnp.float32)
    # Deterministic init mirroring BaseConv.__init__:
    #   conv.weight ~ N(0, 0.01), conv.bias = 0, bn.gamma = 1, bn.beta = 0.
    weight = 0.01 * jax.random.normal(k_w, (Cout, Cin, K, K), dtype=jnp.float32)
    bias = jnp.zeros((Cout,), dtype=jnp.float32)

    configs = [
        (dict(use_bn=False, activation=None), 5e-3),          # module defaults
        (dict(use_bn=False, activation=jax.nn.relu), 5e-3),
        (dict(use_bn=True, activation=jax.nn.relu), 5e-2),     # BN rescales ~1/std
    ]
    for cfg, f32_tol in configs:
        out = base_conv_forward(x, weight, bias, stride=stride, **cfg)
        out = jax.block_until_ready(out)
        assert out.shape == (N, Cout, H, W)

        # Reference with the same bf16-rounded inputs: tight tolerance.
        ref = _reference(x, weight, bias, stride=stride, pad=pad,
                         match_bf16=True, **cfg)
        assert jnp.max(jnp.abs(out - ref)) < 1e-3, cfg

        # Full-f32 reference: loose tolerance (bf16 input rounding only).
        ref32 = _reference(x, weight, bias, stride=stride, pad=pad,
                           match_bf16=False, **cfg)
        assert jnp.max(jnp.abs(out - ref32)) < f32_tol, cfg

    print("KERNEL_OK")
</pallas_src>

<mosaic_0001>
module attributes {stable_mosaic.version = 11 : i64} {
  func.func @_conv_mm_kernel(%arg0: i32, %arg1: memref<512x36xbf16, #tpu.memory_space<vmem>>, %arg2: memref<36x128xbf16, #tpu.memory_space<vmem>>, %arg3: memref<1x128xf32, #tpu.memory_space<vmem>>, %arg4: memref<512x128xf32, #tpu.memory_space<vmem>>) attributes {dimension_semantics = [#tpu.dimension_semantics<parallel>], iteration_bounds = array<i64: 1>, scalar_prefetch = 0 : i64, scratch_operands = 0 : i64, tpu.core_type = #tpu.core_type<tc>, window_params = [{transform_indices = @transform_0, window_bounds = array<i64: 512, 36>}, {pipeline_mode = #tpu.pipeline_mode<synchronous>, transform_indices = @transform_1, window_bounds = array<i64: 36, 128>}, {pipeline_mode = #tpu.pipeline_mode<synchronous>, transform_indices = @transform_2, window_bounds = array<i64: 1, 128>}, {transform_indices = @transform_3, window_bounds = array<i64: 512, 128>}]} {
    %c0 = arith.constant 0 : index
    %c0_0 = arith.constant 0 : index
    %0 = vector.load %arg1[%c0, %c0_0] : memref<512x36xbf16, #tpu.memory_space<vmem>>, vector<512x36xbf16>
    %c0_1 = arith.constant 0 : index
    %c0_2 = arith.constant 0 : index
    %1 = vector.load %arg2[%c0_1, %c0_2] : memref<36x128xbf16, #tpu.memory_space<vmem>>, vector<36x128xbf16>
    %cst = arith.constant dense<0.000000e+00> : vector<512x128xf32>
    %2 = tpu.matmul %0, %1, %cst {dimension_numbers = #tpu.dot_dimension_numbers<[1], [0], [0], [1], [0, 0, 1, 1], [], []>} : vector<512x36xbf16>, vector<36x128xbf16>, vector<512x128xf32> -> vector<512x128xf32>
    %c0_3 = arith.constant 0 : index
    %c0_4 = arith.constant 0 : index
    %3 = vector.load %arg3[%c0_3, %c0_4] : memref<1x128xf32, #tpu.memory_space<vmem>>, vector<1x128xf32>
    %4 = vector.broadcast %3 : vector<1x128xf32> to vector<512x128xf32>
    %5 = arith.addf %2, %4 : vector<512x128xf32>
    %c0_5 = arith.constant 0 : index
    %c0_6 = arith.constant 0 : index
    %6 = vector.load %arg4[%c0_5, %c0_6] : memref<512x128xf32, #tpu.memory_space<vmem>>, vector<512x128xf32>
    tpu.vector_store %arg4[%c0_5, %c0_6], %5 {strides = array<i32>} : memref<512x128xf32, #tpu.memory_space<vmem>>, vector<512x128xf32>,
    return
  }
  func.func @transform_0(%arg0: i32) -> (i32, i32) {
    %c0_i32 = arith.constant 0 : i32
    %c0_i32_0 = arith.constant 0 : i32
    return %arg0, %c0_i32 : i32, i32
  }
  func.func @transform_1(%arg0: i32) -> (i32, i32) {
    %c0_i32 = arith.constant 0 : i32
    %c0_i32_0 = arith.constant 0 : i32
    %c0_i32_1 = arith.constant 0 : i32
    return %c0_i32, %c0_i32_0 : i32, i32
  }
  func.func @transform_2(%arg0: i32) -> (i32, i32) {
    %c0_i32 = arith.constant 0 : i32
    %c0_i32_0 = arith.constant 0 : i32
    %c0_i32_1 = arith.constant 0 : i32
    return %c0_i32, %c0_i32_0 : i32, i32
  }
  func.func @transform_3(%arg0: i32) -> (i32, i32) {
    %c0_i32 = arith.constant 0 : i32
    %c0_i32_0 = arith.constant 0 : i32
    return %arg0, %c0_i32 : i32, i32
  }
}

</mosaic_0001>

<bundles_post_ra>
// kernel: tpu_custom_call.1
= control target key start
LH: loop header
LB: loop body
LE: loop exit
PB: predicated region body
PF: predicated region fallthrough
CT: control target
= control target key end

     0   :  { %vm267_vm0 = vcmask 293888   ;;  %vm364_vm1 = vcmask 1041408   ;;  %s1221_s0 = inlined_call_operand.vmem [shape: bf16[512,36], index: 0, kind: input, shape index: {}]   ;;  %s1222_s1 = inlined_call_operand.vmem [shape: bf16[36,128], index: 1, kind: input, shape index: {}]   ;;  %s1223_s2 = inlined_call_operand.vmem [shape: f32[1,128], index: 2, kind: input, shape index: {}]   ;;  %s1224_s3 = inlined_call_operand.hbm [shape: f32[512,128], index: 3, kind: output, shape index: {}]  }
   0x1   :  { %v921_v0 = vld [vmem:[%s1222_s1] sm:$0xff]   ;;  %v922_v1 = vld [vmem:[%s1222_s1 + $0x8] sm:$0xff]   ;;  %v923_v2 = vld [vmem:[%s1222_s1 + $0x10] ss:$0 sps:$4 sm:$0x33]  }
   0x2   :  { %840 = vmatprep.subr.bf16.mxu0 %v921_v0  ;;  %910 = vmatprep.subr.bf16.mxu1 %v921_v0  ;;  %v924_v3 = vld [vmem:[%s1221_s0] sm:$0xff]   ;;  %v366_v5 = vsel %vm364_vm1, %v923_v2, 0  ;;  %v926_v6 = vld [vmem:[%s1221_s0 + $0x8] sm:$0xff]   ;;  %v928_v8 = vld [vmem:[%s1221_s0 + $0x10] sm:$0xff]  }
   0x3   :  { %841 = vmatpush3.bf16.msra.mxu0 %v921_v0  ;;  %913 = vmatpush3.bf16.msra.mxu1 %v921_v0  ;;  %v925_v4 = vld [vmem:[%s1221_s0 + $0x80] sm:$0xff]   ;;  %v927_v7 = vld [vmem:[%s1221_s0 + $0x88] sm:$0xff]   ;;  %v929_v9 = vld [vmem:[%s1221_s0 + $0x90] sm:$0xff]  }
   0x4   :  { %842 = vmatprep.subr.bf16.mxu0 %v922_v1  ;;  %911 = vmatprep.subr.bf16.mxu1 %v922_v1  ;;  %v930_v10 = vld [vmem:[%s1221_s0 + $0x18] sm:$0xff]   ;;  %v932_v12 = vld [vmem:[%s1221_s0 + $0x20] sm:$0xff]   ;;  %v934_v14 = vld [vmem:[%s1221_s0 + $0x28] sm:$0xff]  }
   0x5   :  { %846 = vmatprep.mubr.msk.bf16.mxu0 %vm267_vm0, %v924_v3  ;;  %878 = vmatprep.mubr.msk.bf16.mxu1 %vm267_vm0, %v925_v4  ;;  %v931_v11 = vld [vmem:[%s1221_s0 + $0x98] sm:$0xff]   ;;  %v933_v13 = vld [vmem:[%s1221_s0 + $0xa0] sm:$0xff]   ;;  %v935_v15 = vld [vmem:[%s1221_s0 + $0xa8] sm:$0xff]  }
   0x6   :  { %v936_v16 = vld [vmem:[%s1221_s0 + $0x30] sm:$0xff]   ;;  %v938_v18 = vld [vmem:[%s1221_s0 + $0x38] sm:$0xff]  }
   0x7   :  { %843 = vmatpush3.bf16.msra.mxu0 %v922_v1  ;;  %914 = vmatpush3.bf16.msra.mxu1 %v922_v1  ;;  %v937_v17 = vld [vmem:[%s1221_s0 + $0xb0] sm:$0xff]   ;;  %v939_v19 = vld [vmem:[%s1221_s0 + $0xb8] sm:$0xff]  }
   0x8   :  { %916 = vmatprep.subr.msk.bf16.mxu0 %vm364_vm1, %v923_v2  ;;  %917 = vmatprep.subr.msk.bf16.mxu1 %vm364_vm1, %v923_v2 }
   0xb   :  { %845 = vmatpush3.bf16.msra.mxu0 %v366_v5  ;;  %915 = vmatpush3.bf16.msra.mxu1 %v366_v5 }
   0xe   :  { %847 = vmatmul.mubr.msk.bf16.vlgmr.msra.gmra.mrb[0].mxu0 %vm267_vm0, %v926_v6  ;;  %879 = vmatmul.mubr.msk.bf16.vlgmr.msra.gmra.mrb[0].mxu1 %vm267_vm0, %v927_v7 }
   0xf   :  { %850 = vmatprep.mubr.msk.bf16.mxu0 %vm267_vm0, %v928_v8  ;;  %882 = vmatprep.mubr.msk.bf16.mxu1 %vm267_vm0, %v929_v9 }
  0x16   :  { %851 = vmatmul.mubr.msk.bf16.gmra.mrb[4].mxu0 %vm267_vm0, %v930_v10  ;;  %883 = vmatmul.mubr.msk.bf16.gmra.mrb[4].mxu1 %vm267_vm0, %v931_v11 }
  0x17   :  { %854 = vmatprep.mubr.msk.bf16.mxu0 %vm267_vm0, %v932_v12  ;;  %886 = vmatprep.mubr.msk.bf16.mxu1 %vm267_vm0, %v933_v13 }
  0x1e   :  { %855 = vmatmul.mubr.msk.bf16.gmra.mrb[8].mxu0 %vm267_vm0, %v934_v14  ;;  %887 = vmatmul.mubr.msk.bf16.gmra.mrb[8].mxu1 %vm267_vm0, %v935_v15 }
  0x1f   :  { %858 = vmatprep.mubr.msk.bf16.mxu0 %vm267_vm0, %v936_v16  ;;  %890 = vmatprep.mubr.msk.bf16.mxu1 %vm267_vm0, %v937_v17 }
  0x20   :  { %8 = vsyncpa [#allocation3], 0  ;;  %v940_v20 = vld [vmem:[%s1221_s0 + $0x40] sm:$0xff]   ;;  %v942_v22 = vld [vmem:[%s1221_s0 + $0x48] sm:$0xff]  }
  0x21   :  { %v941_v21 = vld [vmem:[%s1221_s0 + $0xc0] sm:$0xff]   ;;  %v943_v23 = vld [vmem:[%s1221_s0 + $0xc8] sm:$0xff]   ;;  %v944_v24 = vld [vmem:[%s1221_s0 + $0x50] sm:$0xff]  }
  0x22   :  { %v945_v25 = vld [vmem:[%s1221_s0 + $0xd0] sm:$0xff]   ;;  %v946_v26 = vld [vmem:[%s1221_s0 + $0x58] sm:$0xff]   ;;  %v948_v28 = vld [vmem:[%s1221_s0 + $0x60] sm:$0xff]  }
  0x23   :  { %v947_v27 = vld [vmem:[%s1221_s0 + $0xd8] sm:$0xff]   ;;  %v949_v29 = vld [vmem:[%s1221_s0 + $0xe0] sm:$0xff]   ;;  %v950_v30 = vld [vmem:[%s1221_s0 + $0x68] sm:$0xff]  }
  0x24   :  { %v951_v31 = vld [vmem:[%s1221_s0 + $0xe8] sm:$0xff]   ;;  %v952_v32 = vld [vmem:[%s1221_s0 + $0x70] sm:$0xff]   ;;  %v954_v34 = vld [vmem:[%s1221_s0 + $0x78] sm:$0xff]  }
  0x25   :  { %v953_v33 = vld [vmem:[%s1221_s0 + $0xf0] sm:$0xff]   ;;  %v955_v35 = vld [vmem:[%s1221_s0 + $0xf8] sm:$0xff]   ;;  %v1143_v36 = vld [vmem:[%s1223_s2] ss:$0 sm:$0xff]  ;;  %s980_s0 = smov [#allocation2]  }
  0x26   :  { %859 = vmatmul.mubr.msk.bf16.gmra.mrb[12].mxu0 %vm267_vm0, %v938_v18  ;;  %891 = vmatmul.mubr.msk.bf16.gmra.mrb[12].mxu1 %vm267_vm0, %v939_v19  ;;  %s726_s2 = sshll.u32 %s980_s0, 4  ;;  %s727_s2 = int_to_ptr.vmem [resolvable:$true] %s726_s2 }
  0x27   :  { %862 = vmatprep.mubr.msk.bf16.mxu0 %vm267_vm0, %v940_v20  ;;  %894 = vmatprep.mubr.msk.bf16.mxu1 %vm267_vm0, %v941_v21  ;;  %s956_s27 = scalar_lea.vmem %s727_s2, 8192  ;;  %p961_p1 = scmp.lt.s32.totalorder %s727_s2, %s727_s2 }
  0x28   :  { %p957_p0 = scmp.ne.s32.totalorder %s727_s2, %s956_s27  ;;  %p962_p2 = scmp.lt.s32.totalorder %s956_s27, %s956_s27 }
  0x2a   :  { %p963_p3 = por %p962_p2, %p961_p1 }
  0x2c   :  { %p964_p4 = pnand %p963_p3, %p957_p0 }
  0x2e   :  { %863 = vmatmul.mubr.msk.bf16.gmra.mrb[16].mxu0 %vm267_vm0, %v942_v22  ;;  %895 = vmatmul.mubr.msk.bf16.gmra.mrb[16].mxu1 %vm267_vm0, %v943_v23 }
  0x2f   :  { %866 = vmatprep.mubr.msk.bf16.mxu0 %vm267_vm0, %v944_v24  ;;  %898 = vmatprep.mubr.msk.bf16.mxu1 %vm267_vm0, %v945_v25 }
  0x36   :  { %867 = vmatmul.mubr.msk.bf16.gmra.mrb[20].mxu0 %vm267_vm0, %v946_v26  ;;  %899 = vmatmul.mubr.msk.bf16.gmra.mrb[20].mxu1 %vm267_vm0, %v947_v27 }
  0x37   :  { %870 = vmatprep.mubr.msk.bf16.mxu0 %vm267_vm0, %v948_v28  ;;  %902 = vmatprep.mubr.msk.bf16.mxu1 %vm267_vm0, %v949_v29 }
  0x3e   :  { %871 = vmatmul.mubr.msk.bf16.gmra.mrb[24].mxu0 %vm267_vm0, %v950_v30  ;;  %903 = vmatmul.mubr.msk.bf16.gmra.mrb[24].mxu1 %vm267_vm0, %v951_v31 }
  0x3f   :  { %874 = vmatprep.mubr.msk.bf16.mxu0 %vm267_vm0, %v952_v32  ;;  %906 = vmatprep.mubr.msk.bf16.mxu1 %vm267_vm0, %v953_v33 }
  0x46   :  { %875 = vmatmul.mubr.msk.bf16.gmra.mrb[28].mxu0 %vm267_vm0, %v954_v34  ;;  %907 = vmatmul.mubr.msk.bf16.gmra.mrb[28].mxu1 %vm267_vm0, %v955_v35 }
  0xe1   :  { %v848_v37 = vpop.f32.mrb[0].mxu0  ;;  %v880_v38 = vpop.f32.mrb[0].mxu1 }
  0xe2   :  { %v411_v39 = vadd.f32 %v848_v37, %v1143_v36  ;;  %v539_v40 = vadd.f32 %v880_v38, %v1143_v36  ;;  %v402_v41 = vpop.f32.mrb[1].mxu0  ;;  %v530_v42 = vpop.f32.mrb[1].mxu1 }
  0xe3   :  { %v403_v43 = vadd.f32 %v1143_v36, %v402_v41  ;;  %v531_v44 = vadd.f32 %v1143_v36, %v530_v42  ;;  %v849_v45 = vpop.f32.mrb[2].mxu0  ;;  %v881_v46 = vpop.f32.mrb[2].mxu1 }
  0xe4   :  { %659 = vst [vmem:[#allocation2 + $0x10] sm:$0xff] %v411_v39  ;;  %691 = vst [vmem:[#allocation2 + $0x110] sm:$0xff] %v539_v40  ;;  %v414_v47 = vadd.f32 %v849_v45, %v1143_v36  ;;  %v542_v48 = vadd.f32 %v881_v46, %v1143_v36  ;;  %v405_v49 = vpop.f32.mrb[3].mxu0  ;;  %v533_v50 = vpop.f32.mrb[3].mxu1 }
  0xe5   :  { %657 = vst [vmem:[#allocation2] sm:$0xff] %v403_v43  ;;  %689 = vst [vmem:[#allocation2 + $0x100] sm:$0xff] %v531_v44  ;;  %v406_v51 = vadd.f32 %v1143_v36, %v405_v49  ;;  %v534_v52 = vadd.f32 %v1143_v36, %v533_v50 }
  0xe6   :  { %660 = vst [vmem:[#allocation2 + $0x18] sm:$0xff] %v414_v47  ;;  %692 = vst [vmem:[#allocation2 + $0x118] sm:$0xff] %v542_v48 }
  0xe7   :  { %658 = vst [vmem:[#allocation2 + $0x8] sm:$0xff] %v406_v51  ;;  %690 = vst [vmem:[#allocation2 + $0x108] sm:$0xff] %v534_v52 }
  0xe9   :  { %v852_v53 = vpop.f32.mrb[4].mxu0  ;;  %v884_v54 = vpop.f32.mrb[4].mxu1 }
  0xea   :  { %v427_v55 = vadd.f32 %v852_v53, %v1143_v36  ;;  %v555_v56 = vadd.f32 %v884_v54, %v1143_v36  ;;  %v418_v57 = vpop.f32.mrb[5].mxu0  ;;  %v546_v58 = vpop.f32.mrb[5].mxu1 }
  0xeb   :  { %v419_v59 = vadd.f32 %v1143_v36, %v418_v57  ;;  %v547_v60 = vadd.f32 %v1143_v36, %v546_v58  ;;  %v853_v61 = vpop.f32.mrb[6].mxu0  ;;  %v885_v62 = vpop.f32.mrb[6].mxu1 }
  0xec   :  { %663 = vst [vmem:[#allocation2 + $0x30] sm:$0xff] %v427_v55  ;;  %695 = vst [vmem:[#allocation2 + $0x130] sm:$0xff] %v555_v56  ;;  %v430_v63 = vadd.f32 %v853_v61, %v1143_v36  ;;  %v558_v0 = vadd.f32 %v885_v62, %v1143_v36  ;;  %v421_v1 = vpop.f32.mrb[7].mxu0  ;;  %v549_v2 = vpop.f32.mrb[7].mxu1 }
  0xed   :  { %661 = vst [vmem:[#allocation2 + $0x20] sm:$0xff] %v419_v59  ;;  %693 = vst [vmem:[#allocation2 + $0x120] sm:$0xff] %v547_v60  ;;  %v422_v3 = vadd.f32 %v1143_v36, %v421_v1  ;;  %v550_v4 = vadd.f32 %v1143_v36, %v549_v2 }
  0xee   :  { %664 = vst [vmem:[#allocation2 + $0x38] sm:$0xff] %v430_v63  ;;  %696 = vst [vmem:[#allocation2 + $0x138] sm:$0xff] %v558_v0 }
  0xef   :  { %662 = vst [vmem:[#allocation2 + $0x28] sm:$0xff] %v422_v3  ;;  %694 = vst [vmem:[#allocation2 + $0x128] sm:$0xff] %v550_v4 }
  0xf1   :  { %v856_v5 = vpop.f32.mrb[8].mxu0  ;;  %v888_v6 = vpop.f32.mrb[8].mxu1 }
  0xf2   :  { %v443_v7 = vadd.f32 %v856_v5, %v1143_v36  ;;  %v571_v8 = vadd.f32 %v888_v6, %v1143_v36  ;;  %v434_v9 = vpop.f32.mrb[9].mxu0  ;;  %v562_v10 = vpop.f32.mrb[9].mxu1 }
  0xf3   :  { %v435_v11 = vadd.f32 %v1143_v36, %v434_v9  ;;  %v563_v12 = vadd.f32 %v1143_v36, %v562_v10  ;;  %v857_v13 = vpop.f32.mrb[10].mxu0  ;;  %v889_v14 = vpop.f32.mrb[10].mxu1 }
  0xf4   :  { %667 = vst [vmem:[#allocation2 + $0x50] sm:$0xff] %v443_v7  ;;  %699 = vst [vmem:[#allocation2 + $0x150] sm:$0xff] %v571_v8  ;;  %v446_v15 = vadd.f32 %v857_v13, %v1143_v36  ;;  %v574_v16 = vadd.f32 %v889_v14, %v1143_v36  ;;  %v437_v17 = vpop.f32.mrb[11].mxu0  ;;  %v565_v18 = vpop.f32.mrb[11].mxu1 }
  0xf5   :  { %665 = vst [vmem:[#allocation2 + $0x40] sm:$0xff] %v435_v11  ;;  %697 = vst [vmem:[#allocation2 + $0x140] sm:$0xff] %v563_v12  ;;  %v438_v19 = vadd.f32 %v1143_v36, %v437_v17  ;;  %v566_v20 = vadd.f32 %v1143_v36, %v565_v18 }
  0xf6   :  { %668 = vst [vmem:[#allocation2 + $0x58] sm:$0xff] %v446_v15  ;;  %700 = vst [vmem:[#allocation2 + $0x158] sm:$0xff] %v574_v16 }
  0xf7   :  { %666 = vst [vmem:[#allocation2 + $0x48] sm:$0xff] %v438_v19  ;;  %698 = vst [vmem:[#allocation2 + $0x148] sm:$0xff] %v566_v20 }
  0xf9   :  { %v860_v21 = vpop.f32.mrb[12].mxu0  ;;  %v892_v22 = vpop.f32.mrb[12].mxu1 }
  0xfa   :  { %v459_v23 = vadd.f32 %v860_v21, %v1143_v36  ;;  %v587_v24 = vadd.f32 %v892_v22, %v1143_v36  ;;  %v450_v25 = vpop.f32.mrb[13].mxu0  ;;  %v578_v26 = vpop.f32.mrb[13].mxu1 }
  0xfb   :  { %v451_v27 = vadd.f32 %v1143_v36, %v450_v25  ;;  %v579_v28 = vadd.f32 %v1143_v36, %v578_v26  ;;  %v861_v29 = vpop.f32.mrb[14].mxu0  ;;  %v893_v30 = vpop.f32.mrb[14].mxu1 }
  0xfc   :  { %671 = vst [vmem:[#allocation2 + $0x70] sm:$0xff] %v459_v23  ;;  %703 = vst [vmem:[#allocation2 + $0x170] sm:$0xff] %v587_v24  ;;  %v462_v31 = vadd.f32 %v861_v29, %v1143_v36  ;;  %v590_v32 = vadd.f32 %v893_v30, %v1143_v36  ;;  %v453_v33 = vpop.f32.mrb[15].mxu0  ;;  %v581_v34 = vpop.f32.mrb[15].mxu1 }
  0xfd   :  { %669 = vst [vmem:[#allocation2 + $0x60] sm:$0xff] %v451_v27  ;;  %701 = vst [vmem:[#allocation2 + $0x160] sm:$0xff] %v579_v28  ;;  %v454_v35 = vadd.f32 %v1143_v36, %v453_v33  ;;  %v582_v37 = vadd.f32 %v1143_v36, %v581_v34 }
  0xfe   :  { %672 = vst [vmem:[#allocation2 + $0x78] sm:$0xff] %v462_v31  ;;  %704 = vst [vmem:[#allocation2 + $0x178] sm:$0xff] %v590_v32 }
  0xff   :  { %670 = vst [vmem:[#allocation2 + $0x68] sm:$0xff] %v454_v35  ;;  %702 = vst [vmem:[#allocation2 + $0x168] sm:$0xff] %v582_v37 }
 0x101   :  { %v864_v38 = vpop.f32.mrb[16].mxu0  ;;  %v896_v39 = vpop.f32.mrb[16].mxu1 }
 0x102   :  { %v475_v40 = vadd.f32 %v864_v38, %v1143_v36  ;;  %v603_v41 = vadd.f32 %v896_v39, %v1143_v36  ;;  %v466_v42 = vpop.f32.mrb[17].mxu0  ;;  %v594_v43 = vpop.f32.mrb[17].mxu1 }
 0x103   :  { %v467_v44 = vadd.f32 %v1143_v36, %v466_v42  ;;  %v595_v45 = vadd.f32 %v1143_v36, %v594_v43  ;;  %v865_v46 = vpop.f32.mrb[18].mxu0  ;;  %v897_v47 = vpop.f32.mrb[18].mxu1 }
 0x104   :  { %675 = vst [vmem:[#allocation2 + $0x90] sm:$0xff] %v475_v40  ;;  %707 = vst [vmem:[#allocation2 + $0x190] sm:$0xff] %v603_v41  ;;  %v478_v48 = vadd.f32 %v865_v46, %v1143_v36  ;;  %v606_v49 = vadd.f32 %v897_v47, %v1143_v36  ;;  %v469_v50 = vpop.f32.mrb[19].mxu0  ;;  %v597_v51 = vpop.f32.mrb[19].mxu1 }
 0x105   :  { %673 = vst [vmem:[#allocation2 + $0x80] sm:$0xff] %v467_v44  ;;  %705 = vst [vmem:[#allocation2 + $0x180] sm:$0xff] %v595_v45  ;;  %v470_v52 = vadd.f32 %v1143_v36, %v469_v50  ;;  %v598_v53 = vadd.f32 %v1143_v36, %v597_v51 }
 0x106   :  { %676 = vst [vmem:[#allocation2 + $0x98] sm:$0xff] %v478_v48  ;;  %708 = vst [vmem:[#allocation2 + $0x198] sm:$0xff] %v606_v49 }
 0x107   :  { %674 = vst [vmem:[#allocation2 + $0x88] sm:$0xff] %v470_v52  ;;  %706 = vst [vmem:[#allocation2 + $0x188] sm:$0xff] %v598_v53 }
 0x109   :  { %v868_v54 = vpop.f32.mrb[20].mxu0  ;;  %v900_v55 = vpop.f32.mrb[20].mxu1 }
 0x10a   :  { %v491_v56 = vadd.f32 %v868_v54, %v1143_v36  ;;  %v619_v57 = vadd.f32 %v900_v55, %v1143_v36  ;;  %v482_v58 = vpop.f32.mrb[21].mxu0  ;;  %v610_v59 = vpop.f32.mrb[21].mxu1 }
 0x10b   :  { %v483_v60 = vadd.f32 %v1143_v36, %v482_v58  ;;  %v611_v61 = vadd.f32 %v1143_v36, %v610_v59  ;;  %v869_v62 = vpop.f32.mrb[22].mxu0  ;;  %v901_v63 = vpop.f32.mrb[22].mxu1 }
 0x10c   :  { %679 = vst [vmem:[#allocation2 + $0xb0] sm:$0xff] %v491_v56  ;;  %711 = vst [vmem:[#allocation2 + $0x1b0] sm:$0xff] %v619_v57  ;;  %v494_v0 = vadd.f32 %v869_v62, %v1143_v36  ;;  %v622_v1 = vadd.f32 %v901_v63, %v1143_v36  ;;  %v485_v2 = vpop.f32.mrb[23].mxu0  ;;  %v613_v3 = vpop.f32.mrb[23].mxu1 }
 0x10d   :  { %677 = vst [vmem:[#allocation2 + $0xa0] sm:$0xff] %v483_v60  ;;  %709 = vst [vmem:[#allocation2 + $0x1a0] sm:$0xff] %v611_v61  ;;  %v486_v4 = vadd.f32 %v1143_v36, %v485_v2  ;;  %v614_v5 = vadd.f32 %v1143_v36, %v613_v3 }
 0x10e   :  { %680 = vst [vmem:[#allocation2 + $0xb8] sm:$0xff] %v494_v0  ;;  %712 = vst [vmem:[#allocation2 + $0x1b8] sm:$0xff] %v622_v1 }
 0x10f   :  { %678 = vst [vmem:[#allocation2 + $0xa8] sm:$0xff] %v486_v4  ;;  %710 = vst [vmem:[#allocation2 + $0x1a8] sm:$0xff] %v614_v5 }
 0x111   :  { %v872_v6 = vpop.f32.mrb[24].mxu0  ;;  %v904_v7 = vpop.f32.mrb[24].mxu1 }
 0x112   :  { %v507_v8 = vadd.f32 %v872_v6, %v1143_v36  ;;  %v635_v9 = vadd.f32 %v904_v7, %v1143_v36  ;;  %v498_v10 = vpop.f32.mrb[25].mxu0  ;;  %v626_v11 = vpop.f32.mrb[25].mxu1 }
 0x113   :  { %v499_v12 = vadd.f32 %v1143_v36, %v498_v10  ;;  %v627_v13 = vadd.f32 %v1143_v36, %v626_v11  ;;  %v873_v14 = vpop.f32.mrb[26].mxu0  ;;  %v905_v15 = vpop.f32.mrb[26].mxu1 }
 0x114   :  { %683 = vst [vmem:[#allocation2 + $0xd0] sm:$0xff] %v507_v8  ;;  %715 = vst [vmem:[#allocation2 + $0x1d0] sm:$0xff] %v635_v9  ;;  %v510_v16 = vadd.f32 %v873_v14, %v1143_v36  ;;  %v638_v17 = vadd.f32 %v905_v15, %v1143_v36  ;;  %v501_v18 = vpop.f32.mrb[27].mxu0  ;;  %v629_v19 = vpop.f32.mrb[27].mxu1 }
 0x115   :  { %681 = vst [vmem:[#allocation2 + $0xc0] sm:$0xff] %v499_v12  ;;  %713 = vst [vmem:[#allocation2 + $0x1c0] sm:$0xff] %v627_v13  ;;  %v502_v20 = vadd.f32 %v1143_v36, %v501_v18  ;;  %v630_v21 = vadd.f32 %v1143_v36, %v629_v19 }
 0x116   :  { %684 = vst [vmem:[#allocation2 + $0xd8] sm:$0xff] %v510_v16  ;;  %716 = vst [vmem:[#allocation2 + $0x1d8] sm:$0xff] %v638_v17 }
 0x117   :  { %682 = vst [vmem:[#allocation2 + $0xc8] sm:$0xff] %v502_v20  ;;  %714 = vst [vmem:[#allocation2 + $0x1c8] sm:$0xff] %v630_v21 }
 0x119   :  { %v876_v22 = vpop.f32.mrb[28].mxu0  ;;  %v908_v23 = vpop.f32.mrb[28].mxu1 }
 0x11a   :  { %v523_v24 = vadd.f32 %v876_v22, %v1143_v36  ;;  %v651_v25 = vadd.f32 %v908_v23, %v1143_v36  ;;  %v514_v26 = vpop.f32.mrb[29].mxu0  ;;  %v642_v27 = vpop.f32.mrb[29].mxu1 }
 0x11b   :  { %v515_v28 = vadd.f32 %v1143_v36, %v514_v26  ;;  %v643_v29 = vadd.f32 %v1143_v36, %v642_v27  ;;  %v877_v30 = vpop.f32.mrb[30].mxu0  ;;  %v909_v31 = vpop.f32.mrb[30].mxu1 }
 0x11c   :  { %687 = vst [vmem:[#allocation2 + $0xf0] sm:$0xff] %v523_v24  ;;  %719 = vst [vmem:[#allocation2 + $0x1f0] sm:$0xff] %v651_v25  ;;  %v526_v32 = vadd.f32 %v877_v30, %v1143_v36  ;;  %v654_v33 = vadd.f32 %v909_v31, %v1143_v36  ;;  %v517_v34 = vpop.f32.mrb[31].mxu0  ;;  %v645_v35 = vpop.f32.mrb[31].mxu1 }
 0x11d   :  { %685 = vst [vmem:[#allocation2 + $0xe0] sm:$0xff] %v515_v28  ;;  %717 = vst [vmem:[#allocation2 + $0x1e0] sm:$0xff] %v643_v29  ;;  %v518_v37 = vadd.f32 %v1143_v36, %v517_v34  ;;  %v646_v38 = vadd.f32 %v1143_v36, %v645_v35 }
 0x11e   :  { %688 = vst [vmem:[#allocation2 + $0xf8] sm:$0xff] %v526_v32  ;;  %720 = vst [vmem:[#allocation2 + $0x1f8] sm:$0xff] %v654_v33 }
 0x11f   :  { %686 = vst [vmem:[#allocation2 + $0xe8] sm:$0xff] %v518_v37  ;;  %718 = vst [vmem:[#allocation2 + $0x1e8] sm:$0xff] %v646_v38 }
 0x120   :  { %967 = shalt.err (!%p964_p4)
}
 0x121   :  { %s968_s30 = scalar_lea.hbm %s1224_s3, 8192 }
 0x122   :  { %p969_p5 = scmp.ne.s32.totalorder %s1224_s3, %s968_s30  ;;  %p972_p6 = scmp.lt.u32.totalorder %s968_s30, %s1224_s3 }
 0x124   :  { %p974_p7 = pnand %p972_p6, %p969_p5 }
 0x126   :  { %977 = shalt.err (!%p974_p7)
}
 0x127   :  { %s981_s8 = smov 128   ;;  %s982_s9 = smov 8  }
 0x128   :  { %732 = dma.vmem_to_hbm [thread:$0]  %s727_s2, 8192, %s1224_s3, [#allocation3], %s981_s8, %s981_s8, %s982_s9  }
 0x129   :  { %978 = dma.done.wait [#allocation3], 8192  }
 0x12a   :  { %979 = vsyncadd [#allocation3], 4294959104 }
 0x12b   :  { %736 = vsyncpa [#allocation3], 1 }

</bundles_post_ra>
